<compile_context>
chip_gen: v7x
topology: tpu7x:2x2x1
jax: 0.10.0
libtpu: 0.0.40
codegen_flags: <defaults>
</compile_context>

<pallas_src>
import jax
import jax.numpy as jnp
from jax.experimental import pallas as pl
from jax.experimental.pallas import tpu as pltpu


def _sinusoidal_kernel(loc_ref, w_ref, b_ref, mask_ref, out_ref):
    # loc_ref : (bm, r*dim)            folded locations
    # w_ref   : (r*dim, r*embed_dim)   block-diagonal duplicated weight
    # b_ref   : (1, r*embed_dim)       duplicated bias row
    # mask_ref: (1, r*embed_dim) int32 1 -> cos lane, 0 -> sin lane
    # out_ref : (bm, r*embed_dim)      folded output (lane-dense)
    x = jnp.dot(loc_ref[...], w_ref[...], preferred_element_type=jnp.float32)
    x = x + b_ref[...].astype(jnp.float32)
    cos_lane = jnp.broadcast_to(mask_ref[...], x.shape) == 1
    y = jnp.where(cos_lane, jnp.cos(x), jnp.sin(x))
    out_ref[...] = y.astype(out_ref.dtype)


def sinusoidal_embed(locations, weight, bias, *, dim, embed_dim,
                     tm=8192, out_dtype=None,
                     vmem_block_budget=4 * 1024 * 1024):
    """locations: (..., dim) if dim > 1 else (...,). Returns (..., embed_dim)."""
    if embed_dim % 2 != 0:
        raise ValueError("embed_dim must be even (got %d)" % embed_dim)
    half = embed_dim // 2
    compute_dtype = weight.dtype
    out_dtype = compute_dtype if out_dtype is None else out_dtype

    if dim > 1:
        original_shape = locations.shape[:-1]
    else:
        original_shape = locations.shape
    loc2d = locations.reshape(-1, dim).astype(compute_dtype)
    n = loc2d.shape[0]

    # Fold r consecutive rows into the lane axis -> lane-dense output blocks.
    r = max(1, 128 // embed_dim)
    nf = pl.cdiv(n, r)                               # folded rows needed

    # Folded rows per grid step: honor `tm` original rows and a VMEM budget
    # (in + out bytes per buffer; double-buffered by the pipeline). Keeps the
    # tile big enough to hide the ~0.35us/step overhead yet v7x-safe.
    bytes_per_folded_row = 4 * r * (embed_dim + dim)
    bm = max(1, min(tm // r, vmem_block_budget // bytes_per_folded_row))
    bm = max(8, (bm // 8) * 8)
    bm = min(bm, nf)                                  # tiny inputs: one block

    nf_pad = pl.cdiv(nf, bm) * bm
    n_pad = nf_pad * r
    if n_pad != n:
        loc2d = jnp.pad(loc2d, ((0, n_pad - n), (0, 0)))
    loc_f = loc2d.reshape(nf_pad, r * dim)            # free row-major reshape

    width = r * embed_dim

    # Block-diagonal duplicated weight: column k*embed_dim + j multiplies the
    # k-th folded row by W[:, j mod half]; bias and cos/sin mask follow suit.
    w_dup = jnp.concatenate([weight.T, weight.T], axis=1)        # (dim, embed_dim)
    w_big = w_dup if r == 1 else jnp.kron(jnp.eye(r, dtype=w_dup.dtype), w_dup)
    w_big = w_big.astype(compute_dtype)                          # (r*dim, width)
    b_big = jnp.tile(jnp.concatenate([bias, bias]), r).reshape(1, width)
    b_big = b_big.astype(compute_dtype)
    mask = jnp.tile(
        jnp.concatenate([jnp.ones((half,), jnp.int32),
                         jnp.zeros((half,), jnp.int32)]), r
    ).reshape(1, width)

    out_f = pl.pallas_call(
        _sinusoidal_kernel,
        out_shape=jax.ShapeDtypeStruct((nf_pad, width), out_dtype),
        grid_spec=pltpu.PrefetchScalarGridSpec(
            num_scalar_prefetch=0,
            grid=(nf_pad // bm,),
            in_specs=[
                pl.BlockSpec((bm, r * dim), lambda i: (i, 0)),
                pl.BlockSpec((r * dim, width), lambda i: (0, 0)),
                pl.BlockSpec((1, width), lambda i: (0, 0)),
                pl.BlockSpec((1, width), lambda i: (0, 0)),
            ],
            out_specs=pl.BlockSpec((bm, width), lambda i: (i, 0)),
        ),
        compiler_params=pltpu.CompilerParams(
            dimension_semantics=("parallel",),
        ),
    )(loc_f, w_big, b_big, mask)

    out = out_f.reshape(n_pad, embed_dim)             # free row-major un-fold
    if n_pad != n:
        out = out[:n]
    return out.reshape(original_shape + (embed_dim,))


if __name__ == "__main__":
    # small shapes: dim=3 (3-D positions), embed_dim=32, batch=2, seq=8
    dim = 3
    embed_dim = 32
    half = embed_dim // 2

    key = jax.random.PRNGKey(0)
    k_w, k_b, k_loc = jax.random.split(key, 3)

    # deterministic "Linear" parameters (PyTorch layout: weight (half, dim))
    bound = 1.0 / (dim ** 0.5)
    weight = jax.random.uniform(k_w, (half, dim), jnp.float32, -bound, bound)
    bias = jax.random.uniform(k_b, (half,), jnp.float32, -bound, bound)

    locations = jax.random.normal(k_loc, (2, 8, dim), jnp.float32)

    y = sinusoidal_embed(locations, weight, bias, dim=dim, embed_dim=embed_dim)
    y = jax.block_until_ready(y)

    # pure-JAX reference check
    x_ref = locations.reshape(-1, dim) @ weight.T + bias
    y_ref = jnp.concatenate([jnp.cos(x_ref), jnp.sin(x_ref)], axis=-1)
    y_ref = y_ref.reshape(locations.shape[:-1] + (embed_dim,))
    assert y.shape == (2, 8, embed_dim)
    assert jnp.allclose(y, y_ref, atol=1e-5, rtol=1e-5)

    print("KERNEL_OK")
</pallas_src>

<mosaic_0001>
module attributes {stable_mosaic.version = 11 : i64} {
  func.func @_sinusoidal_kernel(%arg0: i32, %arg1: memref<4x12xf32, #tpu.memory_space<vmem>>, %arg2: memref<12x128xf32, #tpu.memory_space<vmem>>, %arg3: memref<1x128xf32, #tpu.memory_space<vmem>>, %arg4: memref<1x128xi32, #tpu.memory_space<vmem>>, %arg5: memref<4x128xf32, #tpu.memory_space<vmem>>) attributes {dimension_semantics = [#tpu.dimension_semantics<parallel>], iteration_bounds = array<i64: 1>, scalar_prefetch = 0 : i64, scratch_operands = 0 : i64, tpu.core_type = #tpu.core_type<tc>, window_params = [{transform_indices = @transform_0, window_bounds = array<i64: 4, 12>}, {pipeline_mode = #tpu.pipeline_mode<synchronous>, transform_indices = @transform_1, window_bounds = array<i64: 12, 128>}, {pipeline_mode = #tpu.pipeline_mode<synchronous>, transform_indices = @transform_2, window_bounds = array<i64: 1, 128>}, {pipeline_mode = #tpu.pipeline_mode<synchronous>, transform_indices = @transform_3, window_bounds = array<i64: 1, 128>}, {transform_indices = @transform_4, window_bounds = array<i64: 4, 128>}]} {
    %c0 = arith.constant 0 : index
    %c0_0 = arith.constant 0 : index
    %0 = vector.load %arg1[%c0, %c0_0] : memref<4x12xf32, #tpu.memory_space<vmem>>, vector<4x12xf32>
    %c0_1 = arith.constant 0 : index
    %c0_2 = arith.constant 0 : index
    %1 = vector.load %arg2[%c0_1, %c0_2] : memref<12x128xf32, #tpu.memory_space<vmem>>, vector<12x128xf32>
    %cst = arith.constant dense<0.000000e+00> : vector<4x128xf32>
    %2 = tpu.matmul %0, %1, %cst {dimension_numbers = #tpu.dot_dimension_numbers<[1], [0], [0], [1], [0, 0, 1, 1], [], []>} : vector<4x12xf32>, vector<12x128xf32>, vector<4x128xf32> -> vector<4x128xf32>
    %c0_3 = arith.constant 0 : index
    %c0_4 = arith.constant 0 : index
    %3 = vector.load %arg3[%c0_3, %c0_4] : memref<1x128xf32, #tpu.memory_space<vmem>>, vector<1x128xf32>
    %4 = vector.broadcast %3 : vector<1x128xf32> to vector<4x128xf32>
    %5 = arith.addf %2, %4 : vector<4x128xf32>
    %c0_5 = arith.constant 0 : index
    %c0_6 = arith.constant 0 : index
    %6 = vector.load %arg4[%c0_5, %c0_6] : memref<1x128xi32, #tpu.memory_space<vmem>>, vector<1x128xi32>
    %7 = vector.shape_cast %6 : vector<1x128xi32> to vector<1x128xi32>
    %8 = vector.broadcast %7 : vector<1x128xi32> to vector<4x128xi32>
    %c1_i32 = arith.constant 1 : i32
    %9 = vector.broadcast %c1_i32 : i32 to vector<4x128xi32>
    %10 = arith.cmpi eq, %8, %9 : vector<4x128xi32>
    %11 = math.cos %5 : vector<4x128xf32>
    %12 = math.sin %5 : vector<4x128xf32>
    %13 = arith.select %10, %11, %12 : vector<4x128xi1>, vector<4x128xf32>
    %c0_7 = arith.constant 0 : index
    %c0_8 = arith.constant 0 : index
    %14 = vector.load %arg5[%c0_7, %c0_8] : memref<4x128xf32, #tpu.memory_space<vmem>>, vector<4x128xf32>
    tpu.vector_store %arg5[%c0_7, %c0_8], %13 {strides = array<i32>} : memref<4x128xf32, #tpu.memory_space<vmem>>, vector<4x128xf32>,
    return
  }
  func.func @transform_0(%arg0: i32) -> (i32, i32) {
    %c0_i32 = arith.constant 0 : i32
    %c0_i32_0 = arith.constant 0 : i32
    return %arg0, %c0_i32 : i32, i32
  }
  func.func @transform_1(%arg0: i32) -> (i32, i32) {
    %c0_i32 = arith.constant 0 : i32
    %c0_i32_0 = arith.constant 0 : i32
    %c0_i32_1 = arith.constant 0 : i32
    return %c0_i32, %c0_i32_0 : i32, i32
  }
  func.func @transform_2(%arg0: i32) -> (i32, i32) {
    %c0_i32 = arith.constant 0 : i32
    %c0_i32_0 = arith.constant 0 : i32
    %c0_i32_1 = arith.constant 0 : i32
    return %c0_i32, %c0_i32_0 : i32, i32
  }
  func.func @transform_3(%arg0: i32) -> (i32, i32) {
    %c0_i32 = arith.constant 0 : i32
    %c0_i32_0 = arith.constant 0 : i32
    %c0_i32_1 = arith.constant 0 : i32
    return %c0_i32, %c0_i32_0 : i32, i32
  }
  func.func @transform_4(%arg0: i32) -> (i32, i32) {
    %c0_i32 = arith.constant 0 : i32
    %c0_i32_0 = arith.constant 0 : i32
    return %arg0, %c0_i32 : i32, i32
  }
}

</mosaic_0001>

<bundles_post_ra>
// kernel: tpu_custom_call.1
= control target key start
LH: loop header
LB: loop body
LE: loop exit
PB: predicated region body
PF: predicated region fallthrough
CT: control target
= control target key end

     0   :  { %9 = vsyncpa [#allocation3], 0  ;;  %s595_s0 = inlined_call_operand.hbm [shape: f32[4,12], index: 0, kind: input, shape index: {}]   ;;  %s596_s1 = inlined_call_operand.hbm [shape: f32[12,128], index: 1, kind: input, shape index: {}]   ;;  %s597_s2 = inlined_call_operand.vmem [shape: f32[1,128], index: 2, kind: input, shape index: {}]   ;;  %s598_s3 = inlined_call_operand.vmem [shape: s32[1,128], index: 3, kind: input, shape index: {}]   ;;  %s599_s4 = inlined_call_operand.hbm [shape: f32[4,128], index: 4, kind: output, shape index: {}]  }
   0x1   :  { %10 = vsyncpa [#allocation6], 0 }
   0x2   :  { %11 = vsyncpa [#allocation4], 0  ;;  %s484_s15 = smov [#allocation2]   ;;  %s485_s17 = smov [#allocation5]  }
   0x3   :  { %s18_s16 = sshll.u32 %s484_s15, 4  ;;  %s27_s18 = sshll.u32 %s485_s17, 4  ;;  %s19_s16 = int_to_ptr.vmem [resolvable:$true] %s18_s16  ;;  %s524_s18 = int_to_ptr.vmem [resolvable:$true] %s27_s18 }
   0x4   :  { %s412_s21 = scalar_lea.hbm %s595_s0, 64 }
   0x5   :  { %p413_p0 = scmp.ne.s32.totalorder %s595_s0, %s412_s21  ;;  %p416_p1 = scmp.lt.u32.totalorder %s412_s21, %s595_s0 }
   0x7   :  { %p418_p2 = pnand %p416_p1, %p413_p0 }
   0x9   :  { %421 = shalt.err (!%p418_p2)
}
   0xa   :  { %s422_s26 = scalar_lea.vmem %s19_s16, 64  ;;  %p427_p4 = scmp.lt.s32.totalorder %s19_s16, %s19_s16 }
   0xb   :  { %p423_p3 = scmp.ne.s32.totalorder %s19_s16, %s422_s26  ;;  %p428_p5 = scmp.lt.s32.totalorder %s422_s26, %s422_s26 }
   0xd   :  { %p429_p6 = por %p428_p5, %p427_p4 }
   0xf   :  { %p430_p7 = pnand %p429_p6, %p423_p3 }
  0x11   :  { %433 = shalt.err (!%p430_p7)
}
  0x12   :  { %21 = dma.hbm_to_vmem [thread:$0]  %s595_s0, 64, %s19_s16, [#allocation3]  }
  0x13   :  { %s434_s5 = scalar_lea.hbm %s596_s1, 256 }
  0x14   :  { %p435_p8 = scmp.ne.s32.totalorder %s596_s1, %s434_s5  ;;  %p438_p9 = scmp.lt.u32.totalorder %s434_s5, %s596_s1 }
  0x16   :  { %p440_p10 = pnand %p438_p9, %p435_p8 }
  0x18   :  { %443 = shalt.err (!%p440_p10)
}
  0x19   :  { %s444_s10 = scalar_lea.vmem %s524_s18, 256  ;;  %p449_p12 = scmp.lt.s32.totalorder %s524_s18, %s524_s18 }
  0x1a   :  { %p445_p11 = scmp.ne.s32.totalorder %s524_s18, %s444_s10  ;;  %p450_p13 = scmp.lt.s32.totalorder %s444_s10, %s444_s10 }
  0x1c   :  { %p451_p0 = por %p450_p13, %p449_p12 }
  0x1e   :  { %p452_p1 = pnand %p451_p0, %p445_p11 }
  0x20   :  { %455 = shalt.err (!%p452_p1)
}
  0x21   :  { %s486_s0 = smov 128   ;;  %s487_s11 = smov 8  }
  0x22   :  { %33 = dma.hbm_to_vmem [thread:$0]  %s596_s1, 256, %s524_s18, [#allocation6], %s486_s0, %s486_s0, %s487_s11  }
  0x23   :  { %478 = dma.done.wait [#allocation3], 64  }
  0x24   :  { %479 = vsyncadd [#allocation3], 4294967232 }
  0x25   :  { %480 = dma.done.wait [#allocation6], 256  }
  0x26   :  { %481 = vsyncadd [#allocation6], 4294967040  ;;  %v488_v0 = vmov 0.0|0.0   ;;  %vm489_vm0 = vmmov 0   ;;  %v490_v1 = vmov 0.0   ;;  %vm58_vm1 = vcmask 1043456  }
  0x27   :  { %385 = vmatprep.subr.bf16.mxu0 %v488_v0  ;;  %382 = vmatprep.mubr.msk.f32.mxu0 %vm489_vm0, %v490_v1  ;;  %v45_v2 = vld [vmem:[#allocation5] sm:$0xff]  ;;  %v46_v3 = vld [vmem:[#allocation5 + $0x8] sm:$0xf]  ;;  %vm491_vm2 = vmmov 1   ;;  %v44_v5 = vld [vmem:[#allocation2] sm:$0xf] }
  0x28   :  { %vm387_vm3 = vmpackc.low %vm58_vm1, %vm491_vm2  ;;  %v386_v4 = vpack.c.bf16 %v46_v3, %v45_v2  ;;  %vm54_vm4 = vcmask 97280   ;;  %v363_v6 = vld [vmem:[%s597_s2] ss:$0 sm:$0xff]  ;;  %v492_v20 = vmov 683565275   ;;  %s498_s16 = smov [#allocation7]  }
  0x29   :  { %v493_v22 = vmov 2475754826   ;;  %v494_v25 = vmov 2131351028   ;;  %v495_v28 = vmov 2102212464  }
  0x2a   :  { %388 = vmatpush3.bf16.msk.msra.mxu0 %vm387_vm3, %v386_v4  ;;  %v496_v31 = vmov 920167782   ;;  %v497_v34 = vmov 1326507024   ;;  %s353_s17 = sshll.u32 %s498_s16, 4  ;;  %s354_s17 = int_to_ptr.vmem [resolvable:$true] %s353_s17 }
  0x2b   :  { %p461_p3 = scmp.lt.s32.totalorder %s354_s17, %s354_s17 }
  0x2d   :  { %383 = vmatmul.mubr.msk.f32.vlgmr.msra.gmra.mrb[0].mxu0 %vm54_vm4, %v44_v5 }
 0x100   :  { %v128_v7 = vpop.f32.mrb[0].mxu0 }
 0x101   :  { %v558_v8 = vadd.f32 %v363_v6, %v128_v7  ;;  %v384_v9 = vpop.f32.mrb[1].mxu0 }
 0x103   :  { %v141_v10 = vand.u32 2139095040, %v558_v8  ;;  %v138_v14 = vand.u32 2147483647, %v558_v8  ;;  %vm140_vm12 = vcmp.lt.s32.totalorder %v558_v8, 0 }
 0x105   :  { %v142_v11 = vshrl.u32 %v141_v10, 23  ;;  %v145_v17 = vand.u32 8388607, %v138_v14  ;;  %vm139_vm13 = vcmp.le.f32.partialorder %v138_v14, 0.7853982 }
 0x107   :  { %v367_v12 = vadd.s32 4294967169, %v142_v11  ;;  %v146_v36 = vor.u32 8388608, %v145_v17 }
 0x109   :  { %v148_v13 = vadd.s32 1, %v367_v12  ;;  %v186_v50 = vshll.u32 %v146_v36, 8 }
 0x10b   :  { %vm149_vm5 = vcmp.gt.s32.totalorder %v148_v13, 0 }
 0x10c   :  { %v150_v15 = vsel %vm149_vm5, %v148_v13, 0  ;;  %vm230_vm5 = vweird.f32 %v558_v8 }
 0x10d   :  { %v152_v16 = vand.u32 31, %v150_v15  ;;  %v151_v19 = vshrl.u32 %v150_v15, 5 }
 0x10f   :  { %v153_v18 = vsub.s32 32, %v152_v16  ;;  %v155_v21 = vshll.u32 %v492_v20, %v152_v16  ;;  %v158_v23 = vshll.u32 %v493_v22, %v152_v16  ;;  %v161_v27 = vshll.u32 %v494_v25, %v152_v16 }
 0x110   :  { %v164_v30 = vshll.u32 %v495_v28, %v152_v16  ;;  %v167_v33 = vshll.u32 %v496_v31, %v152_v16  ;;  %vm170_vm6 = vcmp.lt.s32.totalorder %v151_v19, 1  ;;  %vm173_vm7 = vcmp.lt.s32.totalorder %v151_v19, 4 }
 0x111   :  { %v156_v24 = vshrl.u32 %v493_v22, %v153_v18  ;;  %v159_v26 = vshrl.u32 %v494_v25, %v153_v18  ;;  %v162_v29 = vshrl.u32 %v495_v28, %v153_v18  ;;  %v165_v32 = vshrl.u32 %v496_v31, %v153_v18 }
 0x112   :  { %v168_v35 = vshrl.u32 %v497_v34, %v153_v18  ;;  %v154_v45 = vshrl.u32 %v492_v20, %v153_v18  ;;  %vm172_vm8 = vcmp.lt.s32.totalorder %v151_v19, 3  ;;  %vm171_vm9 = vcmp.lt.s32.totalorder %v151_v19, 2 }
 0x113   :  { %v157_v37 = vor.u32 %v156_v24, %v155_v21  ;;  %v160_v38 = vor.u32 %v159_v26, %v158_v23  ;;  %v163_v39 = vor.u32 %v162_v29, %v161_v27  ;;  %v166_v40 = vor.u32 %v165_v32, %v164_v30  ;;  %v366_v32 = vld [vmem:[%s598_s3] ss:$0 sm:$0xff]  ;;  %s456_s3 = scalar_lea.vmem %s354_s17, 64 }
 0x114   :  { %v169_v41 = vor.u32 %v168_v35, %v167_v33  ;;  %vm137_vm14 = vcmp.eq.s32.totalorder %v366_v32, 1  ;;  %p457_p2 = scmp.ne.s32.totalorder %s354_s17, %s456_s3  ;;  %p462_p4 = scmp.lt.s32.totalorder %s456_s3, %s456_s3 }
 0x115   :  { %v175_v42 = vsel %vm173_vm7, %v163_v39, 2102212464  ;;  %v178_v43 = vsel %vm170_vm6, %v157_v37, %v160_v38  ;;  %v182_v44 = vsel %vm170_vm6, %v160_v38, %v163_v39  ;;  %v179_v46 = vsel %vm173_vm7, %v166_v40, 920167782 }
 0x116   :  { %v183_v47 = vsel %vm173_vm7, %v169_v41, 1326507024  ;;  %v180_v48 = vsel %vm172_vm8, %v163_v39, %v179_v46  ;;  %v174_v51 = vsel %vm170_vm6, %v154_v45, %v157_v37  ;;  %v176_v52 = vsel %vm172_vm8, %v160_v38, %v175_v42  ;;  %p463_p5 = por %p462_p4, %p461_p3 }
 0x117   :  { %v184_v49 = vsel %vm172_vm8, %v166_v40, %v183_v47  ;;  %v181_v53 = vsel %vm171_vm9, %v178_v43, %v180_v48  ;;  %v177_v59 = vsel %vm171_vm9, %v174_v51, %v176_v52 }
 0x118   :  { %v185_v54 = vsel %vm171_vm9, %v182_v44, %v184_v49  ;;  %v567_v57 = vmul.u32.u64.low %v186_v50, %v181_v53  ;;  %v568_v58 = vmul.u32.u64.high %v186_v50, %v181_v53, %v567_v57  ;;  %v193_v61 = vmul.u32 %v186_v50, %v177_v59  ;;  %p464_p6 = pnand %p463_p5, %p457_p2 }
 0x119   :  { %v564_v55 = vmul.u32.u64.low %v186_v50, %v185_v54  ;;  %v565_v56 = vmul.u32.u64.high %v186_v50, %v185_v54, %v564_v55 }
 0x11a   :  { %v196_v60 = vadd.s32 1, %v568_v58 }
 0x11b   :  { %vm195_vm10 = vc.u32 %v565_v56, %v567_v57  ;;  %v194_v10 = vadd.s32 %v567_v57, %v565_v56 }
 0x11c   :  { %v197_v62 = vsel %vm195_vm10, %v196_v60, %v568_v58 }
 0x11d   :  { %v198_v63 = vadd.s32 %v197_v62, %v193_v61 }
 0x11f   :  { %v199_v0 = vadd.s32 536870912, %v198_v63 }
 0x121   :  { %v200_v1 = vshrl.u32 %v199_v0, 30 }
 0x123   :  { %v201_v2 = vshll.u32 %v200_v1, 30  ;;  %v224_v23 = vsub.s32 4, %v200_v1 }
 0x125   :  { %v202_v3 = vsub.s32 %v198_v63, %v201_v2  ;;  %v225_v26 = vsel %vm140_vm12, %v224_v23, %v200_v1 }
 0x126   :  { %v227_v28 = vsel %vm139_vm13, 0, %v225_v26 }
 0x127   :  { %v204_v4 = vsub.s32 0, %v202_v3  ;;  %v334_v29 = vadd.s32 3, %v227_v28  ;;  %v231_v30 = vand.u32 3, %v227_v28 }
 0x129   :  { %v368_v5 = vmin.u32 %v204_v4, %v202_v3  ;;  %v335_v31 = vand.u32 3, %v334_v29  ;;  %vm236_vm15 = vcmp.eq.s32.totalorder %v231_v30, 2  ;;  %vm233_vm1 = vcmp.eq.s32.totalorder %v231_v30, 0 }
 0x12a   :  { %vm232_vm3 = vcmp.lt.s32.totalorder %v231_v30, 2 }
 0x12b   :  { %v206_v6 = vclz %v368_v5  ;;  %vm340_vm0 = vcmp.eq.s32.totalorder %v335_v31, 2  ;;  %vm337_vm2 = vcmp.eq.s32.totalorder %v335_v31, 0  ;;  %vm336_vm4 = vcmp.lt.s32.totalorder %v335_v31, 2 }
 0x12d   :  { %v369_v7 = vadd.s32 4294967294, %v206_v6 }
 0x12f   :  { %vm370_vm11 = vcmp.lt.s32.totalorder %v369_v7, 0 }
 0x130   :  { %v209_v9 = vsel %vm370_vm11, 0, %v369_v7 }
 0x131   :  { %v210_v11 = vsub.s32 32, %v209_v9  ;;  %v214_v12 = vsub.s32 4294967266, %v209_v9  ;;  %v211_v13 = vshll.u32 %v202_v3, %v209_v9 }
 0x133   :  { %v212_v15 = vshrl.u32 %v194_v10, %v210_v11  ;;  %v215_v16 = vadd.s32 127, %v214_v12 }
 0x135   :  { %v213_v17 = vor.u32 %v212_v15, %v211_v13  ;;  %v216_v18 = vshll.u32 %v215_v16, 23 }
 0x137   :  { %v217_v19 = vor.u32 4788187, %v216_v18  ;;  %v220_v21 = vcvt.s32.f32 %v213_v17 }
 0x139   :  { %v218_v20 = vand.u32 2147483647, %v217_v19 }
 0x13b   :  { %v221_v22 = vmul.f32 %v220_v21, %v218_v20 }
 0x13d   :  { %v222_v24 = vxor.u32 2147483648, %v221_v22 }
 0x13f   :  { %v223_v25 = vsel %vm140_vm12, %v222_v24, %v221_v22 }
 0x140   :  { %v226_v27 = vsel %vm139_vm13, %v558_v8, %v223_v25 }
 0x141   :  { %408 = vcosq.f32 %v226_v27 }
 0x142   :  { %410 = vsinq.f32 %v226_v27 }
 0x14b   :  { %v409_v33 = vpop.eup %408 }
 0x14c   :  { %v411_v34 = vpop.eup %410  ;;  %v237_v35 = vxor.u32 2147483648, %v409_v33 }
 0x14d   :  { %v234_v36 = vxor.u32 2147483648, %v411_v34 }
 0x14e   :  { %v238_v14 = vsel %vm236_vm15, %v237_v35, %v411_v34  ;;  %v342_v37 = vsel %vm340_vm0, %v237_v35, %v411_v34 }
 0x14f   :  { %v235_v38 = vsel %vm233_vm1, %v409_v33, %v234_v36  ;;  %v339_v39 = vsel %vm337_vm2, %v409_v33, %v234_v36 }
 0x150   :  { %v239_v40 = vsel %vm232_vm3, %v235_v38, %v238_v14  ;;  %v343_v41 = vsel %vm336_vm4, %v339_v39, %v342_v37 }
 0x151   :  { %v240_v42 = vsel %vm230_vm5, nan, %v239_v40  ;;  %v344_v43 = vsel %vm230_vm5, nan, %v343_v41 }
 0x152   :  { %v345_v44 = vsel %vm137_vm14, %v240_v42, %v344_v43 }
 0x153   :  { %346 = vst [vmem:[#allocation7] sm:$0xf] %v345_v44 }
 0x154   :  { %467 = shalt.err (!%p464_p6)
}
 0x155   :  { %s468_s20 = scalar_lea.hbm %s599_s4, 64 }
 0x156   :  { %p469_p7 = scmp.ne.s32.totalorder %s599_s4, %s468_s20  ;;  %p472_p8 = scmp.lt.u32.totalorder %s468_s20, %s599_s4 }
 0x158   :  { %p474_p9 = pnand %p472_p8, %p469_p7 }
 0x15a   :  { %477 = shalt.err (!%p474_p9)
}
 0x15b   :  { %356 = dma.vmem_to_hbm [thread:$0]  %s354_s17, 64, %s599_s4, [#allocation4]  }
 0x15c   :  { %482 = dma.done.wait [#allocation4], 64  }
 0x15d   :  { %483 = vsyncadd [#allocation4], 4294967232 }
 0x15e   :  { %360 = vsyncpa [#allocation3], 1 }
 0x15f   :  { %361 = vsyncpa [#allocation6], 1 }
 0x160   :  { %362 = vsyncpa [#allocation4], 1 }

</bundles_post_ra>
